<compile_context>
chip_gen: v7x
topology: tpu7x:2x2x1
jax: 0.10.0
libtpu: 0.0.40
codegen_flags: <defaults>
</compile_context>

<pallas_src>
import functools
import math

import jax
import jax.numpy as jnp
from jax import lax
from jax.experimental import pallas as pl
from jax.experimental.pallas import tpu as pltpu

# ----- configuration (the `conf` dict of RegionLoss_1Class), deterministic ----
ANCHORS = [1.08, 1.19, 3.42, 4.41, 6.63, 11.38, 9.42, 5.11, 16.62, 10.52]
ANCHOR_STEP = 2
NUM_ANCHORS = len(ANCHORS) // ANCHOR_STEP          # 5
OBJECT_SCALE = 5.0
NO_OBJECT_SCALE = 1.0
COORD_SCALE = 1.0
SIL_THRESH = 0.6
# TODO(synk): the reference's timing prints and the python-side `self.seen`
# training-step counter have no kernel equivalent; the seen==0 path is used.


# ------------------------------- Pallas kernel --------------------------------
def _region_loss_kernel(pred_ref, tscal_ref, out_ref, *, Bt, A, HW, S, fused):
    # pred_ref : fused -> (Bt, A, 5*HW) block, else (Bt, A, 5, HW) block (pred dtype)
    # tscal_ref: (B*4,) f32 SMEM, per batch [gx, gy, gw, gh]
    # out_ref  : (1, 1, 8) partial (unscaled, default-target) loss sums for this tile.
    g = pl.program_id(0)

    a_iota = lax.broadcasted_iota(jnp.int32, (A, HW), 0)
    hw_iota = lax.broadcasted_iota(jnp.int32, (A, HW), 1)

    # grid_x / grid_y via float floor-divide trick (avoids vector int div/mod);
    # the +0.5 keeps a >=0.5/S margin from integer boundaries -> exact result.
    hw_f = hw_iota.astype(jnp.float32)
    grid_y = jnp.floor((hw_f + 0.5) * jnp.float32(1.0 / S))
    grid_x = hw_f - grid_y * jnp.float32(S)

    # anchor w/h broadcast along the anchor axis from compile-time constants.
    anc_w = jnp.full((A, HW), ANCHORS[0], jnp.float32)
    anc_h = jnp.full((A, HW), ANCHORS[1], jnp.float32)
    for a in range(1, A):
        sel = a_iota == a
        anc_w = jnp.where(sel, jnp.float32(ANCHORS[ANCHOR_STEP * a]), anc_w)
        anc_h = jnp.where(sel, jnp.float32(ANCHORS[ANCHOR_STEP * a + 1]), anc_h)

    def body(i, carry):
        acc_x, acc_y, acc_w, acc_h, acc_c = carry
        b = g * Bt + i                      # global batch index (dynamic scalar)

        row = pred_ref[i]                   # (A, 5*HW) or (A, 5, HW)
        if fused:
            tx = row[:, 0 * HW:1 * HW].astype(jnp.float32)
            ty = row[:, 1 * HW:2 * HW].astype(jnp.float32)
            tw = row[:, 2 * HW:3 * HW].astype(jnp.float32)
            th = row[:, 3 * HW:4 * HW].astype(jnp.float32)
            tc = row[:, 4 * HW:5 * HW].astype(jnp.float32)
        else:
            tx = row[:, 0, :].astype(jnp.float32)
            ty = row[:, 1, :].astype(jnp.float32)
            tw = row[:, 2, :].astype(jnp.float32)
            th = row[:, 3, :].astype(jnp.float32)
            tc = row[:, 4, :].astype(jnp.float32)

        # sigmoid as a single EUP push
        sx = 0.5 * jnp.tanh(0.5 * tx) + 0.5
        sy = 0.5 * jnp.tanh(0.5 * ty) + 0.5
        pconf = 0.5 * jnp.tanh(0.5 * tc) + 0.5

        # decoded (detached) boxes in grid-cell units
        bx = sx + grid_x
        by = sy + grid_y
        bw = jnp.exp(tw) * anc_w
        bh = jnp.exp(th) * anc_h
        hbw = 0.5 * bw
        hbh = 0.5 * bh

        # per-batch ground-truth scalars (flat SMEM, dynamic index; scalar ALU)
        base = b * 4
        gx = tscal_ref[base + 0]
        gy = tscal_ref[base + 1]
        gw = tscal_ref[base + 2]
        gh = tscal_ref[base + 3]
        gx_lo = gx - 0.5 * gw
        gx_hi = gx + 0.5 * gw
        gy_lo = gy - 0.5 * gh
        gy_hi = gy + 0.5 * gh
        g_area = gw * gh

        # center-format IoU pieces of every predicted box vs. the single gt box
        mn_x = jnp.minimum(bx - hbw, gx_lo)
        mx_x = jnp.maximum(bx + hbw, gx_hi)
        mn_y = jnp.minimum(by - hbh, gy_lo)
        mx_y = jnp.maximum(by + hbh, gy_hi)
        cw = (bw + gw) - (mx_x - mn_x)
        ch = (bh + gh) - (mx_y - mn_y)
        inter = jnp.maximum(cw, 0.0) * jnp.maximum(ch, 0.0)
        union = bw * bh + g_area - inter          # always > 0
        # division-free threshold: iou > thr  <=>  inter > thr * union
        above = inter > jnp.float32(SIL_THRESH) * union

        # "default" (seen<12800, non-best-cell) targets: coords (0.5,0.5,0,0),
        # conf target 0 with no-object mask.  The single best cell per sample is
        # corrected by O(B) scalar math in the wrapper.
        acc_x = acc_x + (sx - 0.5) ** 2
        acc_y = acc_y + (sy - 0.5) ** 2
        acc_w = acc_w + tw * tw
        acc_h = acc_h + th * th
        acc_c = acc_c + jnp.where(above, 0.0,
                                  jnp.float32(NO_OBJECT_SCALE) * (pconf * pconf))
        return (acc_x, acc_y, acc_w, acc_h, acc_c)

    zeros = jnp.zeros((A, HW), jnp.float32)
    unroll = True if Bt <= 4 else 4
    acc_x, acc_y, acc_w, acc_h, acc_c = lax.fori_loop(
        0, Bt, body, (zeros, zeros, zeros, zeros, zeros), unroll=unroll)

    # cross-lane reductions once per grid step (5 total), not per sample
    lx = jnp.sum(acc_x)
    ly = jnp.sum(acc_y)
    lw = jnp.sum(acc_w)
    lh = jnp.sum(acc_h)
    lc = jnp.sum(acc_c)

    lane = lax.broadcasted_iota(jnp.int32, (1, 1, 8), 2)
    out = jnp.where(lane == 0, lx, 0.0)
    out = jnp.where(lane == 1, ly, out)
    out = jnp.where(lane == 2, lw, out)
    out = jnp.where(lane == 3, lh, out)
    out = jnp.where(lane == 4, lc, out)
    out_ref[...] = out.astype(jnp.float32)


# --------------------------------- wrapper ------------------------------------
def region_loss_forward(pred, target, train_out=True):
    """pred: (B, num_anchors*5, H, W) NCHW; target: (B, 4) normalized cx,cy,w,h."""
    B, C, H, W = pred.shape
    assert H == W, "reference semantics only consistent for square feature maps"
    assert C == NUM_ANCHORS * 5
    S = H
    A = NUM_ANCHORS
    HW = H * W
    fused = (HW % 128 == 0)     # aligned lane slices when possible (S=16,32,...)

    # free reshape only (no transpose, no dtype cast -> no extra HBM round trip)
    if fused:
        pred_k = pred.reshape(B, A, 5 * HW)
    else:
        pred_k = pred.reshape(B, A, 5, HW)

    # ---- per-batch scalar targets + best-cell corrections (tiny, stays in XLA)
    anchors = jnp.asarray(ANCHORS, jnp.float32).reshape(A, 2)
    tgt = target.astype(jnp.float32)
    gx = tgt[:, 0] * S
    gy = tgt[:, 1] * S
    gw = tgt[:, 2] * S
    gh = tgt[:, 3] * S
    gi = gx.astype(jnp.int32)   # int() truncation (gx >= 0)
    gj = gy.astype(jnp.int32)

    awk = anchors[None, :, 0]
    ahk = anchors[None, :, 1]
    inter_a = jnp.minimum(awk, gw[:, None]) * jnp.minimum(ahk, gh[:, None])
    iou_a = inter_a / (awk * ahk + (gw * gh)[:, None] - inter_a)
    best = jnp.argmax(iou_a, axis=1).astype(jnp.int32)   # first max == strict '>'
    aw_b = anchors[best, 0]
    ah_b = anchors[best, 1]
    txt = gx - gi.astype(jnp.float32)
    tyt = gy - gj.astype(jnp.float32)
    twt = jnp.log(gw / aw_b)
    tht = jnp.log(gh / ah_b)

    # gather the 5 raw predictions at (b, best, :, gj, gi) -- O(5*B) scalars
    pred5 = pred.reshape(B, A, 5, H, W)
    bidx = jnp.arange(B)
    pb = pred5[bidx, best, :, gj, gi].astype(jnp.float32)   # (B, 5)
    sxb = jax.nn.sigmoid(pb[:, 0])
    syb = jax.nn.sigmoid(pb[:, 1])
    twb = pb[:, 2]
    thb = pb[:, 3]
    pcb = jax.nn.sigmoid(pb[:, 4])
    bxb = sxb + gi.astype(jnp.float32)
    byb = syb + gj.astype(jnp.float32)
    bwb = jnp.exp(twb) * aw_b
    bhb = jnp.exp(thb) * ah_b
    mnx = jnp.minimum(bxb - 0.5 * bwb, gx - 0.5 * gw)
    mxx = jnp.maximum(bxb + 0.5 * bwb, gx + 0.5 * gw)
    mny = jnp.minimum(byb - 0.5 * bhb, gy - 0.5 * gh)
    mxy = jnp.maximum(byb + 0.5 * bhb, gy + 0.5 * gh)
    cwb = bwb + gw - (mxx - mnx)
    chb = bhb + gh - (mxy - mny)
    inter_b = jnp.maximum(cwb, 0.0) * jnp.maximum(chb, 0.0)
    union_b = bwb * bhb + gw * gh - inter_b
    iou_b = inter_b / union_b
    # same division-free decision as the kernel's no-object mask
    noobj_b = jnp.where(inter_b > SIL_THRESH * union_b, 0.0, NO_OBJECT_SCALE)

    # replace the kernel's default-target contribution at the best cell with the
    # true (best-cell) one -- all O(B) scalar math
    corr_x = jnp.sum((sxb - txt) ** 2 - (sxb - 0.5) ** 2)
    corr_y = jnp.sum((syb - tyt) ** 2 - (syb - 0.5) ** 2)
    corr_w = jnp.sum((twb - twt) ** 2 - twb ** 2)
    corr_h = jnp.sum((thb - tht) ** 2 - thb ** 2)
    corr_c = jnp.sum(OBJECT_SCALE * (pcb - iou_b) ** 2 - noobj_b * pcb ** 2)

    tscal = jnp.stack([gx, gy, gw, gh], axis=1).reshape(-1)   # (B*4,) f32, 1-D SMEM

    # ---- batch tiling: size block against VMEM (padded layout), keep nb even
    # and >= 4 when B allows (v7x: 2 TCs, >=2 pipelined steps per TC).
    lane_pad = lambda n: ((n + 127) // 128) * 128
    bpe = jnp.dtype(pred.dtype).itemsize
    if fused:
        per_batch_vmem = 8 * lane_pad(5 * HW) * bpe        # A(=5)->8 sublanes
    else:
        per_batch_vmem = A * 8 * lane_pad(HW) * bpe        # 5->8 sublanes per anchor
    bt_cap = max(1, min(64, (4 * 1024 * 1024) // per_batch_vmem))
    if B >= 4:
        bt_cap = min(bt_cap, B // 4)
    elif B > 1:
        bt_cap = min(bt_cap, B // 2)
    bt_cap = max(1, bt_cap)
    divisors = [d for d in range(1, bt_cap + 1) if B % d == 0]
    even_nb = [d for d in divisors if (B // d) % 2 == 0]
    Bt = max(even_nb) if even_nb else max(divisors)
    nb = B // Bt

    block_bytes = Bt * per_batch_vmem
    vmem_limit = int(min(32 * 1024 * 1024,
                         max(8 * 1024 * 1024, 2 * block_bytes + 2 * 1024 * 1024)))

    kernel = functools.partial(_region_loss_kernel,
                               Bt=Bt, A=A, HW=HW, S=S, fused=fused)
    if fused:
        pred_spec = pl.BlockSpec((Bt, A, 5 * HW), lambda g: (g, 0, 0))
    else:
        pred_spec = pl.BlockSpec((Bt, A, 5, HW), lambda g: (g, 0, 0, 0))

    partials = pl.pallas_call(
        kernel,
        out_shape=jax.ShapeDtypeStruct((nb, 1, 8), jnp.float32),
        grid=(nb,),
        in_specs=[
            pred_spec,
            pl.BlockSpec(memory_space=pltpu.MemorySpace.SMEM),
        ],
        out_specs=pl.BlockSpec((1, 1, 8), lambda g: (g, 0, 0)),
        compiler_params=pltpu.CompilerParams(
            dimension_semantics=("parallel",),
            vmem_limit_bytes=vmem_limit),
    )(pred_k, tscal)

    sums = jnp.sum(partials.reshape(nb, 8), axis=0)
    loss_x = COORD_SCALE * (sums[0] + corr_x) * 0.5
    loss_y = COORD_SCALE * (sums[1] + corr_y) * 0.5
    loss_w = COORD_SCALE * (sums[2] + corr_w) * 0.5
    loss_h = COORD_SCALE * (sums[3] + corr_h) * 0.5
    loss_c = (sums[4] + corr_c) * 0.5
    total = loss_x + loss_y + loss_w + loss_h + loss_c
    if train_out:
        return (total, loss_x, loss_y, loss_w, loss_h, loss_c)
    return total


# --------------------- pure-JAX reference (for self-check) --------------------
def region_loss_ref(pred, target):
    B, C, H, W = pred.shape
    S = H
    A = NUM_ANCHORS
    anchors = jnp.asarray(ANCHORS, jnp.float32).reshape(A, 2)
    p = pred.reshape(B, A, 5, S, S).astype(jnp.float32)
    sx = jax.nn.sigmoid(p[:, :, 0])
    sy = jax.nn.sigmoid(p[:, :, 1])
    tw = p[:, :, 2]
    th = p[:, :, 3]
    pconf = jax.nn.sigmoid(p[:, :, 4])
    col = jnp.arange(S, dtype=jnp.float32)[None, :]
    row = jnp.arange(S, dtype=jnp.float32)[:, None]
    bx = sx + col
    by = sy + row
    bw = jnp.exp(tw) * anchors[:, 0][None, :, None, None]
    bh = jnp.exp(th) * anchors[:, 1][None, :, None, None]
    gx = target[:, 0] * S
    gy = target[:, 1] * S
    gw = target[:, 2] * S
    gh = target[:, 3] * S
    gi = gx.astype(jnp.int32)
    gj = gy.astype(jnp.int32)
    gxb = gx[:, None, None, None]
    gyb = gy[:, None, None, None]
    gwb = gw[:, None, None, None]
    ghb = gh[:, None, None, None]
    mnx = jnp.minimum(bx - bw / 2, gxb - gwb / 2)
    mxx = jnp.maximum(bx + bw / 2, gxb + gwb / 2)
    mny = jnp.minimum(by - bh / 2, gyb - ghb / 2)
    mxy = jnp.maximum(by + bh / 2, gyb + ghb / 2)
    cw = bw + gwb - (mxx - mnx)
    ch = bh + ghb - (mxy - mny)
    inter = jnp.where((cw <= 0) | (ch <= 0), 0.0, cw * ch)
    ious = inter / (bw * bh + gwb * ghb - inter)
    conf_mask = jnp.where(ious > SIL_THRESH, 0.0, NO_OBJECT_SCALE)
    awk = anchors[None, :, 0]
    ahk = anchors[None, :, 1]
    ia = jnp.minimum(awk, gw[:, None]) * jnp.minimum(ahk, gh[:, None])
    best = jnp.argmax(ia / (awk * ahk + (gw * gh)[:, None] - ia), axis=1)
    onehot = ((jnp.arange(A)[None, :, None, None] == best[:, None, None, None]) &
              (jnp.arange(S)[None, None, :, None] == gj[:, None, None, None]) &
              (jnp.arange(S)[None, None, None, :] == gi[:, None, None, None]))
    conf_mask = jnp.sqrt(jnp.where(onehot, OBJECT_SCALE, conf_mask))
    cm = jnp.ones((B, A, S, S), jnp.float32)
    txt = (gx - gi)[:, None, None, None]
    tyt = (gy - gj)[:, None, None, None]
    twt = jnp.log(gw / anchors[best, 0])[:, None, None, None]
    tht = jnp.log(gh / anchors[best, 1])[:, None, None, None]
    tgt_x = jnp.where(onehot, txt, 0.5)
    tgt_y = jnp.where(onehot, tyt, 0.5)
    tgt_w = jnp.where(onehot, twt, 0.0)
    tgt_h = jnp.where(onehot, tht, 0.0)
    iou_best = jnp.sum(jnp.where(onehot, ious, 0.0), axis=(1, 2, 3), keepdims=True)
    tgt_c = jnp.where(onehot, iou_best, 0.0)
    lx = COORD_SCALE * jnp.sum((sx * cm - tgt_x * cm) ** 2) / 2
    ly = COORD_SCALE * jnp.sum((sy * cm - tgt_y * cm) ** 2) / 2
    lw = COORD_SCALE * jnp.sum((tw * cm - tgt_w * cm) ** 2) / 2
    lh = COORD_SCALE * jnp.sum((th * cm - tgt_h * cm) ** 2) / 2
    lc = jnp.sum((pconf * conf_mask - tgt_c * conf_mask) ** 2) / 2
    return (lx + ly + lw + lh + lc, lx, ly, lw, lh, lc)


if __name__ == "__main__":
    key = jax.random.PRNGKey(0)
    k1, k2 = jax.random.split(key)
    B, S = 2, 16
    pred = 0.5 * jax.random.normal(k1, (B, NUM_ANCHORS * 5, S, S), jnp.float32)
    target = jax.random.uniform(k2, (B, 4), jnp.float32, minval=0.15, maxval=0.8)

    out = region_loss_forward(pred, target, train_out=True)
    out = jax.block_until_ready(out)

    ref = region_loss_ref(pred, target)
    for got, want in zip(out, ref):
        g, w = float(got), float(want)
        assert abs(g - w) <= 2e-3 * max(1.0, abs(w)), (g, w)
    print("KERNEL_OK")
</pallas_src>

<mosaic_0001>
module attributes {stable_mosaic.version = 11 : i64} {
  func.func @_region_loss_kernel(%arg0: i32, %arg1: memref<1x5x1280xf32, #tpu.memory_space<vmem>>, %arg2: memref<8xf32, #tpu.memory_space<smem>>, %arg3: memref<1x1x8xf32, #tpu.memory_space<vmem>>) attributes {dimension_semantics = [#tpu.dimension_semantics<parallel>], iteration_bounds = array<i64: 2>, scalar_prefetch = 0 : i64, scratch_operands = 0 : i64, tpu.core_type = #tpu.core_type<tc>, window_params = [{transform_indices = @transform_0, window_bounds = array<i64: 1, 5, 1280>}, {transform_indices = @transform_1, window_bounds = array<i64: 8>}, {transform_indices = @transform_2, window_bounds = array<i64: 1, 1, 8>}]} {
    %0 = tpu.iota {dimensions = array<i32: 0>} : vector<5x256xi32>
    %1 = tpu.iota {dimensions = array<i32: 1>} : vector<5x256xi32>
    %2 = arith.sitofp %1 : vector<5x256xi32> to vector<5x256xf32>
    %cst = arith.constant 5.000000e-01 : f32
    %3 = vector.broadcast %cst : f32 to vector<5x256xf32>
    %4 = arith.addf %2, %3 : vector<5x256xf32>
    %cst_0 = arith.constant 6.250000e-02 : f32
    %5 = vector.broadcast %cst_0 : f32 to vector<5x256xf32>
    %6 = arith.mulf %4, %5 : vector<5x256xf32>
    %7 = math.floor %6 : vector<5x256xf32>
    %cst_1 = arith.constant 1.600000e+01 : f32
    %8 = vector.broadcast %cst_1 : f32 to vector<5x256xf32>
    %9 = arith.mulf %7, %8 : vector<5x256xf32>
    %10 = arith.subf %2, %9 : vector<5x256xf32>
    %cst_2 = arith.constant 1.080000e+00 : f32
    %11 = vector.broadcast %cst_2 : f32 to vector<5x256xf32>
    %cst_3 = arith.constant 1.190000e+00 : f32
    %12 = vector.broadcast %cst_3 : f32 to vector<5x256xf32>
    %c1_i32 = arith.constant 1 : i32
    %13 = vector.broadcast %c1_i32 : i32 to vector<5x256xi32>
    %14 = arith.cmpi eq, %0, %13 : vector<5x256xi32>
    %cst_4 = arith.constant 3.420000e+00 : f32
    %15 = vector.broadcast %cst_4 : f32 to vector<5x256xf32>
    %16 = arith.select %14, %15, %11 : vector<5x256xi1>, vector<5x256xf32>
    %cst_5 = arith.constant 4.410000e+00 : f32
    %17 = vector.broadcast %cst_5 : f32 to vector<5x256xf32>
    %18 = arith.select %14, %17, %12 : vector<5x256xi1>, vector<5x256xf32>
    %c2_i32 = arith.constant 2 : i32
    %19 = vector.broadcast %c2_i32 : i32 to vector<5x256xi32>
    %20 = arith.cmpi eq, %0, %19 : vector<5x256xi32>
    %cst_6 = arith.constant 6.630000e+00 : f32
    %21 = vector.broadcast %cst_6 : f32 to vector<5x256xf32>
    %22 = arith.select %20, %21, %16 : vector<5x256xi1>, vector<5x256xf32>
    %cst_7 = arith.constant 1.138000e+01 : f32
    %23 = vector.broadcast %cst_7 : f32 to vector<5x256xf32>
    %24 = arith.select %20, %23, %18 : vector<5x256xi1>, vector<5x256xf32>
    %c3_i32 = arith.constant 3 : i32
    %25 = vector.broadcast %c3_i32 : i32 to vector<5x256xi32>
    %26 = arith.cmpi eq, %0, %25 : vector<5x256xi32>
    %cst_8 = arith.constant 9.420000e+00 : f32
    %27 = vector.broadcast %cst_8 : f32 to vector<5x256xf32>
    %28 = arith.select %26, %27, %22 : vector<5x256xi1>, vector<5x256xf32>
    %cst_9 = arith.constant 5.110000e+00 : f32
    %29 = vector.broadcast %cst_9 : f32 to vector<5x256xf32>
    %30 = arith.select %26, %29, %24 : vector<5x256xi1>, vector<5x256xf32>
    %c4_i32 = arith.constant 4 : i32
    %31 = vector.broadcast %c4_i32 : i32 to vector<5x256xi32>
    %32 = arith.cmpi eq, %0, %31 : vector<5x256xi32>
    %cst_10 = arith.constant 1.662000e+01 : f32
    %33 = vector.broadcast %cst_10 : f32 to vector<5x256xf32>
    %34 = arith.select %32, %33, %28 : vector<5x256xi1>, vector<5x256xf32>
    %cst_11 = arith.constant 1.052000e+01 : f32
    %35 = vector.broadcast %cst_11 : f32 to vector<5x256xf32>
    %36 = arith.select %32, %35, %30 : vector<5x256xi1>, vector<5x256xf32>
    %cst_12 = arith.constant 0.000000e+00 : f32
    %37 = vector.broadcast %cst_12 : f32 to vector<5x256xf32>
    %c0_i32 = arith.constant 0 : i32
    %c1_i32_13 = arith.constant 1 : i32
    %38 = arith.muli %arg0, %c1_i32_13 : i32
    %39 = arith.addi %38, %c0_i32 : i32
    %40 = arith.index_cast %c0_i32 : i32 to index
    %c0 = arith.constant 0 : index
    %c0_14 = arith.constant 0 : index
    %41 = vector.load %arg1[%40, %c0, %c0_14] : memref<1x5x1280xf32, #tpu.memory_space<vmem>>, vector<1x5x1280xf32>
    %42 = vector.shape_cast %41 : vector<1x5x1280xf32> to vector<5x1280xf32>
    %43 = vector.extract_strided_slice %42 {offsets = [0, 0], sizes = [5, 256], strides = [1, 1]} : vector<5x1280xf32> to vector<5x256xf32>
    %44 = vector.extract_strided_slice %42 {offsets = [0, 256], sizes = [5, 256], strides = [1, 1]} : vector<5x1280xf32> to vector<5x256xf32>
    %45 = vector.extract_strided_slice %42 {offsets = [0, 512], sizes = [5, 256], strides = [1, 1]} : vector<5x1280xf32> to vector<5x256xf32>
    %46 = vector.extract_strided_slice %42 {offsets = [0, 768], sizes = [5, 256], strides = [1, 1]} : vector<5x1280xf32> to vector<5x256xf32>
    %47 = vector.extract_strided_slice %42 {offsets = [0, 1024], sizes = [5, 256], strides = [1, 1]} : vector<5x1280xf32> to vector<5x256xf32>
    %cst_15 = arith.constant 5.000000e-01 : f32
    %48 = vector.broadcast %cst_15 : f32 to vector<5x256xf32>
    %49 = arith.mulf %48, %43 : vector<5x256xf32>
    %50 = math.tanh %49 : vector<5x256xf32>
    %cst_16 = arith.constant 5.000000e-01 : f32
    %51 = vector.broadcast %cst_16 : f32 to vector<5x256xf32>
    %52 = arith.mulf %51, %50 : vector<5x256xf32>
    %cst_17 = arith.constant 5.000000e-01 : f32
    %53 = vector.broadcast %cst_17 : f32 to vector<5x256xf32>
    %54 = arith.addf %52, %53 : vector<5x256xf32>
    %cst_18 = arith.constant 5.000000e-01 : f32
    %55 = vector.broadcast %cst_18 : f32 to vector<5x256xf32>
    %56 = arith.mulf %55, %44 : vector<5x256xf32>
    %57 = math.tanh %56 : vector<5x256xf32>
    %cst_19 = arith.constant 5.000000e-01 : f32
    %58 = vector.broadcast %cst_19 : f32 to vector<5x256xf32>
    %59 = arith.mulf %58, %57 : vector<5x256xf32>
    %cst_20 = arith.constant 5.000000e-01 : f32
    %60 = vector.broadcast %cst_20 : f32 to vector<5x256xf32>
    %61 = arith.addf %59, %60 : vector<5x256xf32>
    %cst_21 = arith.constant 5.000000e-01 : f32
    %62 = vector.broadcast %cst_21 : f32 to vector<5x256xf32>
    %63 = arith.mulf %62, %47 : vector<5x256xf32>
    %64 = math.tanh %63 : vector<5x256xf32>
    %cst_22 = arith.constant 5.000000e-01 : f32
    %65 = vector.broadcast %cst_22 : f32 to vector<5x256xf32>
    %66 = arith.mulf %65, %64 : vector<5x256xf32>
    %cst_23 = arith.constant 5.000000e-01 : f32
    %67 = vector.broadcast %cst_23 : f32 to vector<5x256xf32>
    %68 = arith.addf %66, %67 : vector<5x256xf32>
    %69 = arith.addf %54, %10 : vector<5x256xf32>
    %70 = arith.addf %61, %7 : vector<5x256xf32>
    %71 = math.exp %45 : vector<5x256xf32>
    %72 = arith.mulf %71, %34 : vector<5x256xf32>
    %73 = math.exp %46 : vector<5x256xf32>
    %74 = arith.mulf %73, %36 : vector<5x256xf32>
    %cst_24 = arith.constant 5.000000e-01 : f32
    %75 = vector.broadcast %cst_24 : f32 to vector<5x256xf32>
    %76 = arith.mulf %75, %72 : vector<5x256xf32>
    %cst_25 = arith.constant 5.000000e-01 : f32
    %77 = vector.broadcast %cst_25 : f32 to vector<5x256xf32>
    %78 = arith.mulf %77, %74 : vector<5x256xf32>
    %c4_i32_26 = arith.constant 4 : i32
    %79 = arith.muli %39, %c4_i32_26 : i32
    %c0_i32_27 = arith.constant 0 : i32
    %80 = arith.addi %79, %c0_i32_27 : i32
    %81 = arith.index_cast %80 : i32 to index
    %82 = memref.load %arg2[%81] : memref<8xf32, #tpu.memory_space<smem>>
    %c1_i32_28 = arith.constant 1 : i32
    %83 = arith.addi %79, %c1_i32_28 : i32
    %84 = arith.index_cast %83 : i32 to index
    %85 = memref.load %arg2[%84] : memref<8xf32, #tpu.memory_space<smem>>
    %c2_i32_29 = arith.constant 2 : i32
    %86 = arith.addi %79, %c2_i32_29 : i32
    %87 = arith.index_cast %86 : i32 to index
    %88 = memref.load %arg2[%87] : memref<8xf32, #tpu.memory_space<smem>>
    %c3_i32_30 = arith.constant 3 : i32
    %89 = arith.addi %79, %c3_i32_30 : i32
    %90 = arith.index_cast %89 : i32 to index
    %91 = memref.load %arg2[%90] : memref<8xf32, #tpu.memory_space<smem>>
    %cst_31 = arith.constant 5.000000e-01 : f32
    %92 = arith.mulf %cst_31, %88 : f32
    %93 = arith.subf %82, %92 : f32
    %cst_32 = arith.constant 5.000000e-01 : f32
    %94 = arith.mulf %cst_32, %88 : f32
    %95 = arith.addf %82, %94 : f32
    %cst_33 = arith.constant 5.000000e-01 : f32
    %96 = arith.mulf %cst_33, %91 : f32
    %97 = arith.subf %85, %96 : f32
    %cst_34 = arith.constant 5.000000e-01 : f32
    %98 = arith.mulf %cst_34, %91 : f32
    %99 = arith.addf %85, %98 : f32
    %100 = arith.mulf %88, %91 : f32
    %101 = arith.subf %69, %76 : vector<5x256xf32>
    %102 = vector.broadcast %93 : f32 to vector<5x256xf32>
    %103 = arith.minimumf %101, %102 : vector<5x256xf32>
    %104 = arith.addf %69, %76 : vector<5x256xf32>
    %105 = vector.broadcast %95 : f32 to vector<5x256xf32>
    %106 = arith.maximumf %104, %105 : vector<5x256xf32>
    %107 = arith.subf %70, %78 : vector<5x256xf32>
    %108 = vector.broadcast %97 : f32 to vector<5x256xf32>
    %109 = arith.minimumf %107, %108 : vector<5x256xf32>
    %110 = arith.addf %70, %78 : vector<5x256xf32>
    %111 = vector.broadcast %99 : f32 to vector<5x256xf32>
    %112 = arith.maximumf %110, %111 : vector<5x256xf32>
    %113 = vector.broadcast %88 : f32 to vector<5x256xf32>
    %114 = arith.addf %72, %113 : vector<5x256xf32>
    %115 = arith.subf %106, %103 : vector<5x256xf32>
    %116 = arith.subf %114, %115 : vector<5x256xf32>
    %117 = vector.broadcast %91 : f32 to vector<5x256xf32>
    %118 = arith.addf %74, %117 : vector<5x256xf32>
    %119 = arith.subf %112, %109 : vector<5x256xf32>
    %120 = arith.subf %118, %119 : vector<5x256xf32>
    %cst_35 = arith.constant 0.000000e+00 : f32
    %121 = vector.broadcast %cst_35 : f32 to vector<5x256xf32>
    %122 = arith.maximumf %116, %121 : vector<5x256xf32>
    %cst_36 = arith.constant 0.000000e+00 : f32
    %123 = vector.broadcast %cst_36 : f32 to vector<5x256xf32>
    %124 = arith.maximumf %120, %123 : vector<5x256xf32>
    %125 = arith.mulf %122, %124 : vector<5x256xf32>
    %126 = arith.mulf %72, %74 : vector<5x256xf32>
    %127 = vector.broadcast %100 : f32 to vector<5x256xf32>
    %128 = arith.addf %126, %127 : vector<5x256xf32>
    %129 = arith.subf %128, %125 : vector<5x256xf32>
    %cst_37 = arith.constant 6.000000e-01 : f32
    %130 = vector.broadcast %cst_37 : f32 to vector<5x256xf32>
    %131 = arith.mulf %130, %129 : vector<5x256xf32>
    %132 = arith.cmpf ogt, %125, %131 : vector<5x256xf32>
    %cst_38 = arith.constant 5.000000e-01 : f32
    %133 = vector.broadcast %cst_38 : f32 to vector<5x256xf32>
    %134 = arith.subf %54, %133 : vector<5x256xf32>
    %135 = arith.mulf %134, %134 : vector<5x256xf32>
    %136 = arith.addf %37, %135 : vector<5x256xf32>
    %cst_39 = arith.constant 5.000000e-01 : f32
    %137 = vector.broadcast %cst_39 : f32 to vector<5x256xf32>
    %138 = arith.subf %61, %137 : vector<5x256xf32>
    %139 = arith.mulf %138, %138 : vector<5x256xf32>
    %140 = arith.addf %37, %139 : vector<5x256xf32>
    %141 = arith.mulf %45, %45 : vector<5x256xf32>
    %142 = arith.addf %37, %141 : vector<5x256xf32>
    %143 = arith.mulf %46, %46 : vector<5x256xf32>
    %144 = arith.addf %37, %143 : vector<5x256xf32>
    %145 = arith.mulf %68, %68 : vector<5x256xf32>
    %cst_40 = arith.constant 1.000000e+00 : f32
    %146 = vector.broadcast %cst_40 : f32 to vector<5x256xf32>
    %147 = arith.mulf %146, %145 : vector<5x256xf32>
    %cst_41 = arith.constant 0.000000e+00 : f32
    %148 = vector.broadcast %cst_41 : f32 to vector<5x256xf32>
    %149 = arith.select %132, %148, %147 : vector<5x256xi1>, vector<5x256xf32>
    %150 = arith.addf %37, %149 : vector<5x256xf32>
    %c1_i32_42 = arith.constant 1 : i32
    %151 = vector.shape_cast %136 : vector<5x256xf32> to vector<1x5x256xf32>
    %cst_43 = arith.constant dense<0.000000e+00> : vector<1xf32>
    %152 = vector.multi_reduction <add>, %151, %cst_43 [1, 2] : vector<1x5x256xf32> to vector<1xf32>
    %153 = vector.shape_cast %152 : vector<1xf32> to vector<1x1x1xf32>
    %154 = vector.extract %153[0, 0, 0] : f32 from vector<1x1x1xf32>
    %155 = vector.shape_cast %140 : vector<5x256xf32> to vector<1x5x256xf32>
    %cst_44 = arith.constant dense<0.000000e+00> : vector<1xf32>
    %156 = vector.multi_reduction <add>, %155, %cst_44 [1, 2] : vector<1x5x256xf32> to vector<1xf32>
    %157 = vector.shape_cast %156 : vector<1xf32> to vector<1x1x1xf32>
    %158 = vector.extract %157[0, 0, 0] : f32 from vector<1x1x1xf32>
    %159 = vector.shape_cast %142 : vector<5x256xf32> to vector<1x5x256xf32>
    %cst_45 = arith.constant dense<0.000000e+00> : vector<1xf32>
    %160 = vector.multi_reduction <add>, %159, %cst_45 [1, 2] : vector<1x5x256xf32> to vector<1xf32>
    %161 = vector.shape_cast %160 : vector<1xf32> to vector<1x1x1xf32>
    %162 = vector.extract %161[0, 0, 0] : f32 from vector<1x1x1xf32>
    %163 = vector.shape_cast %144 : vector<5x256xf32> to vector<1x5x256xf32>
    %cst_46 = arith.constant dense<0.000000e+00> : vector<1xf32>
    %164 = vector.multi_reduction <add>, %163, %cst_46 [1, 2] : vector<1x5x256xf32> to vector<1xf32>
    %165 = vector.shape_cast %164 : vector<1xf32> to vector<1x1x1xf32>
    %166 = vector.extract %165[0, 0, 0] : f32 from vector<1x1x1xf32>
    %167 = vector.shape_cast %150 : vector<5x256xf32> to vector<1x5x256xf32>
    %cst_47 = arith.constant dense<0.000000e+00> : vector<1xf32>
    %168 = vector.multi_reduction <add>, %167, %cst_47 [1, 2] : vector<1x5x256xf32> to vector<1xf32>
    %169 = vector.shape_cast %168 : vector<1xf32> to vector<1x1x1xf32>
    %170 = vector.extract %169[0, 0, 0] : f32 from vector<1x1x1xf32>
    %171 = tpu.iota {dimensions = array<i32: 2>} : vector<1x1x8xi32>
    %c0_i32_48 = arith.constant 0 : i32
    %172 = vector.broadcast %c0_i32_48 : i32 to vector<1x1x8xi32>
    %173 = arith.cmpi eq, %171, %172 : vector<1x1x8xi32>
    %cst_49 = arith.constant 0.000000e+00 : f32
    %174 = vector.broadcast %154 : f32 to vector<1x1x8xf32>
    %175 = vector.broadcast %cst_49 : f32 to vector<1x1x8xf32>
    %176 = arith.select %173, %174, %175 : vector<1x1x8xi1>, vector<1x1x8xf32>
    %c1_i32_50 = arith.constant 1 : i32
    %177 = vector.broadcast %c1_i32_50 : i32 to vector<1x1x8xi32>
    %178 = arith.cmpi eq, %171, %177 : vector<1x1x8xi32>
    %179 = vector.broadcast %158 : f32 to vector<1x1x8xf32>
    %180 = arith.select %178, %179, %176 : vector<1x1x8xi1>, vector<1x1x8xf32>
    %c2_i32_51 = arith.constant 2 : i32
    %181 = vector.broadcast %c2_i32_51 : i32 to vector<1x1x8xi32>
    %182 = arith.cmpi eq, %171, %181 : vector<1x1x8xi32>
    %183 = vector.broadcast %162 : f32 to vector<1x1x8xf32>
    %184 = arith.select %182, %183, %180 : vector<1x1x8xi1>, vector<1x1x8xf32>
    %c3_i32_52 = arith.constant 3 : i32
    %185 = vector.broadcast %c3_i32_52 : i32 to vector<1x1x8xi32>
    %186 = arith.cmpi eq, %171, %185 : vector<1x1x8xi32>
    %187 = vector.broadcast %166 : f32 to vector<1x1x8xf32>
    %188 = arith.select %186, %187, %184 : vector<1x1x8xi1>, vector<1x1x8xf32>
    %c4_i32_53 = arith.constant 4 : i32
    %189 = vector.broadcast %c4_i32_53 : i32 to vector<1x1x8xi32>
    %190 = arith.cmpi eq, %171, %189 : vector<1x1x8xi32>
    %191 = vector.broadcast %170 : f32 to vector<1x1x8xf32>
    %192 = arith.select %190, %191, %188 : vector<1x1x8xi1>, vector<1x1x8xf32>
    %c0_54 = arith.constant 0 : index
    %c0_55 = arith.constant 0 : index
    %c0_56 = arith.constant 0 : index
    %193 = vector.load %arg3[%c0_54, %c0_55, %c0_56] : memref<1x1x8xf32, #tpu.memory_space<vmem>>, vector<1x1x8xf32>
    tpu.vector_store %arg3[%c0_54, %c0_55, %c0_56], %192 {strides = array<i32>} : memref<1x1x8xf32, #tpu.memory_space<vmem>>, vector<1x1x8xf32>,
    return
  }
  func.func @transform_0(%arg0: i32) -> (i32, i32, i32) {
    %c0_i32 = arith.constant 0 : i32
    %c0_i32_0 = arith.constant 0 : i32
    %c0_i32_1 = arith.constant 0 : i32
    return %arg0, %c0_i32, %c0_i32_0 : i32, i32, i32
  }
  func.func @transform_1(%arg0: i32) -> i32 {
    %c0_i32 = arith.constant 0 : i32
    %c0_i32_0 = arith.constant 0 : i32
    return %c0_i32 : i32
  }
  func.func @transform_2(%arg0: i32) -> (i32, i32, i32) {
    %c0_i32 = arith.constant 0 : i32
    %c0_i32_0 = arith.constant 0 : i32
    %c0_i32_1 = arith.constant 0 : i32
    return %arg0, %c0_i32, %c0_i32_0 : i32, i32, i32
  }
}

</mosaic_0001>

<bundles_post_ra>
// kernel: tpu_custom_call.1
= control target key start
LH: loop header
LB: loop body
LE: loop exit
PB: predicated region body
PF: predicated region fallthrough
CT: control target
= control target key end

     0   :  { %7 = vsyncpa [#allocation4], 0  ;;  %s931_s0 = inlined_call_operand.vmem [shape: f32[2,5,1280], index: 0, kind: input, shape index: {}]   ;;  %s932_s1 = inlined_call_operand.vmem [shape: f32[8], index: 1, kind: input, shape index: {}]   ;;  %s933_s2 = inlined_call_operand.hbm [shape: f32[2,1,8], index: 2, kind: output, shape index: {}]  }
   0x1   :  { %8 = vsyncpa [#allocation3], 0 }
   0x2   :  { %10 = vsyncpa [#allocation3 + $0x1], 0  ;;  %s688_s9 = smov 0   ;;  %s690_s10 = smov 0  }
   0x3   :  { %s692_s11 = smov 0   ;;  %s694_s12 = smov 0  }
   0x4 LB: > { %s709_s13 = sadd.s32 4294967295, %s667_s12   ;;  %s488_s14 = sadd.s32 4294967294, %s667_s12   ;;  %s667_s12 = sphi %s694_s12, %s940_s12   ;;  %s663_s11 = sphi %s692_s11, %s939_s11   ;;  %s659_s10 = sphi %s690_s10, %s938_s10   ;;  %s655_s9 = sphi %s688_s9, %s937_s9  }
   0x5   : > { %s713_s15 = sadd.s32 1, %s667_s12   ;;  %s70_s16 = sadd.s32 1, %s663_s11 }
   0x6   : > { %s67_s17 = ssub.s32 %s667_s12, %s713_s15  ;;  %p80_p0 = scmp.ne.s32.totalorder %s663_s11, %s659_s10 }
   0x7   : > { %p68_p1 = scmp.eq.s32.totalorder %s67_s17, 0  ;;  %p81_p2 = scmp.eq.s32.totalorder %s709_s13, 1 }
   0x8   : > { %p86_p3 = scmp.ne.s32.totalorder %s659_s10, %s655_s9  ;;  %p87_p4 = scmp.eq.s32.totalorder %s488_s14, 1 }
   0x9   : > { %s724_s18 = scalar_select %p68_p1, %s663_s11, %s70_s16  }
   0xa   : > { %p726_p5 = por %p81_p2, %p80_p0  ;;  %p730_p6 = por %p87_p4, %p86_p3 }
   0xb   : > { %p489_p7 = scmp.ge.s32.totalorder %s667_s12, 1  ;;  %p94_p8 = scmp.lt.s32.totalorder %s667_s12, 3 }
   0xc   : > { %p528_p9 = scmp.eq.s32.totalorder %s709_s13, 0  ;;  %s107_s24 = sshll.u32 %s932_s1, 4  ;;  %s108_s24 = int_to_ptr.vmem [resolvable:$true] %s107_s24 }
   0xd   : > { %p737_p10 = pnand %p489_p7, %p94_p8  ;;  %s586_s25 = scalar_lea.vmem %s108_s24, 16 }
   0xe   : > { %p587_p13 = scmp.ne.s32.totalorder %s108_s24, %s586_s25  ;;  %p594_p3 = scmp.lt.s32.totalorder %s108_s24, %s108_s24 }
   0xf   : > { %p520_p11 = pneg %p737_p10  ;;  %p595_p4 = scmp.lt.s32.totalorder %s586_s25, %s586_s25 }
  0x11   : > { %p521_p12 = pnand %p528_p9, %p520_p11  ;;  %p596_p7 = por %p595_p4, %p594_p3 }
  0x13   : > { %p588_p0 = pneg %p521_p12 }
  0x15   : > { %p589_p1 = pnand %p588_p0, %p587_p13 }
  0x17   : > { %p590_p2 = pneg %p589_p1 }
  0x19   : > { %p597_p8 = pnand %p596_p7, %p590_p2 }
  0x1b   : > { %600 = shalt.err (!%p597_p8)
}
  0x1c   : > { %s669_s26 = smov [#allocation2]   ;;  %128 = sbr.rel (%p737_p10) target bundleno = 314 (0x13a), region = 28 }
  0x1d   : > { %523 = dma.vmem_to_smem (!%p521_p12), %s108_s24, 16, %s669_s26, [#allocation4]  }
  0x23   : > { %646 = dma.done.wait (%p528_p9), [#allocation4], 16  }
  0x24   : > { %648 = vsyncadd (%p528_p9), [#allocation4], 4294967280 }
  0x25   : > { %134 = sfence }
  0x26   : > { %p150_p11 = scmp.lt.s32.totalorder %s709_s13, 1  ;;  %v155_v0 = vlaneseq  ;;  %s761_s28 = sshll.u32 %s709_s13, 2  ;;  %vm330_vm1 = vcmask 1044480   ;;  %v670_v7 = vmov 1.08   ;;  %vm406_vm12 = vcmask 57344  }
  0x27   : > { %v671_v9 = vmov 1.19   ;;  %s242_s5 = sadd.s32 2, %s761_s28  ;;  %s244_s7 = sadd.s32 3, %s761_s28 }
  0x28   : > { %s151_s27 = scalar_select %p150_p11, %s709_s13, 1  ;;  %v756_v1 = vand.u32 127, %v155_v0  ;;  %v758_v2 = vshrl.u32 %v155_v0, 7 }
  0x29   : > { %s794_s6 = sld [smem:[#allocation2 + %s242_s5]]  ;;  %s240_s14 = sadd.s32 1, %s761_s28 }
  0x2a   : > { %s503_s29 = smul.u32 80, %s151_s27  ;;  %v764_v3 = vadd.s32 128, %v756_v1  ;;  %v160_v4 = vcvt.s32.f32 %v756_v1  ;;  %vm172_vm0 = vcmp.eq.s32.totalorder %v758_v2, 1  ;;  %vm175_vm2 = vcmp.eq.s32.totalorder %v758_v2, 2  ;;  %s800_s8 = sld [smem:[#allocation2 + %s761_s28]] }
  0x2b   : > { %v173_v8 = vsel %vm172_vm0, 3.42, %v670_v7  ;;  %v174_v10 = vsel %vm172_vm0, 4.41, %v671_v9  ;;  %vm178_vm3 = vcmp.eq.s32.totalorder %v758_v2, 3  ;;  %s807_s16 = sld [smem:[#allocation2 + %s244_s7]] }
  0x2c   : > { %s772_s4 = scalar_lea.vmem %s931_s0, %s503_s29  ;;  %v161_v5 = vcvt.s32.f32 %v764_v3  ;;  %v162_v6 = vadd.f32 0.5, %v160_v4  ;;  %v176_v39 = vsel %vm175_vm2, 6.63, %v173_v8  ;;  %v177_v42 = vsel %vm175_vm2, 11.38, %v174_v10  ;;  %s824_s21 = sld [smem:[#allocation2 + %s240_s14]] }
  0x2d   : > { %v184_v11 = vld [vmem:[%s772_s4] sm:$0x1f]  ;;  %v185_v12 = vld [vmem:[%s772_s4 + $0x8] sm:$0x1f]  ;;  %v186_v23 = vld [vmem:[%s772_s4 + $0x10] sm:$0x1f] }
  0x2e   : > { %v188_v13 = vld [vmem:[%s772_s4 + $0x20] sm:$0x1f]  ;;  %v163_v14 = vadd.f32 0.5, %v161_v5  ;;  %v783_v15 = vmul.f32 0.0625, %v162_v6  ;;  %v194_v16 = vmul.f32 0.5, %v184_v11  ;;  %v195_v17 = vmul.f32 0.5, %v185_v12 }
  0x2f   : > { %v189_v18 = vld [vmem:[%s772_s4 + $0x28] sm:$0x1f]  ;;  %v316_v20 = vmul.f32 %v188_v13, %v188_v13  ;;  %v222_v22 = vmul.f32 1.442695, %v188_v13  ;;  %v187_v25 = vld [vmem:[%s772_s4 + $0x18] sm:$0x1f]  ;;  %v273_v0 = vstv %s794_s6 }
  0x30   : > { %v224_v19 = vmul.f32 1.442695, %v189_v18  ;;  %v317_v21 = vmul.f32 %v189_v18, %v189_v18  ;;  %v787_v24 = vmul.f32 0.0625, %v163_v14  ;;  %566 = vtanh.f32 %v194_v16  ;;  %v190_v27 = vld [vmem:[%s772_s4 + $0x30] sm:$0x1f]  ;;  %s246_s17 = smul.f32 0.5, %s794_s6 }
  0x31   : > { %v202_v26 = vmul.f32 0.5, %v186_v23  ;;  %568 = vtanh.f32 %v195_v17  ;;  %v355_v28 = vsel %vm330_vm1, %v316_v20, 0.0  ;;  %v203_v30 = vmul.f32 0.5, %v187_v25  ;;  %v191_v31 = vld [vmem:[%s772_s4 + $0x38] sm:$0x1f]  ;;  %s249_s24 = smul.f32 0.5, %s807_s16 }
  0x32   : > { %v356_v29 = vsel %vm330_vm1, %v317_v21, 0.0  ;;  %v166_v32 = vfloor.f32 %v783_v15  ;;  %570 = vpow2.f32 %v224_v19  ;;  %v228_v34 = vmul.f32 1.442695, %v190_v27  ;;  %v192_v43 = vld [vmem:[%s772_s4 + $0x40] sm:$0x1f]  ;;  %s831_s22 = ssub.f32 %s800_s8, %s246_s17  ;;  %s252_s27 = smul.f32 %s807_s16, %s794_s6 }
  0x33   : > { %v357_v33 = vadd.f32 %v356_v29, %v355_v28  ;;  %572 = vpow2.f32 %v222_v22  ;;  %v230_v35 = vmul.f32 1.442695, %v191_v31  ;;  %v320_v36 = vmul.f32 %v190_v27, %v190_v27  ;;  %v193_v47 = vld [vmem:[%s772_s4 + $0x48] sm:$0x1f]  ;;  %s838_s23 = sadd.f32 %s246_s17, %s800_s8  ;;  %s148_s3 = sand.u32 1, %s659_s10  }
  0x34   : > { %v167_v37 = vfloor.f32 %v787_v24  ;;  %574 = vtanh.f32 %v202_v26  ;;  %v321_v38 = vmul.f32 %v191_v31, %v191_v31  ;;  %vm181_vm4 = vcmp.eq.s32.totalorder %v758_v2, 4  ;;  %s852_s25 = ssub.f32 %s824_s21, %s249_s24  ;;  %s500_s5 = sshll.u32 %s709_s13, 4 }
  0x35   : > { %358 = vadd.xlane.f32.xlu1 %v357_v33  ;;  %576 = vtanh.f32 %v203_v30  ;;  %v367_v40 = vsel %vm330_vm1, %v320_v36, 0.0  ;;  %v168_v44 = vmul.f32 16.0, %v166_v32  ;;  %v179_v46 = vsel %vm178_vm3, 9.42, %v176_v39  ;;  %s855_s26 = sadd.f32 %s249_s24, %s824_s21  ;;  %s149_s6 = scalar_lea.vmem [#allocation5], %s148_s3 }
  0x36   : > { %578 = vpow2.f32 %v228_v34  ;;  %v368_v41 = vsel %vm330_vm1, %v321_v38, 0.0  ;;  %v169_v48 = vmul.f32 16.0, %v167_v37  ;;  %v180_v49 = vsel %vm178_vm3, 5.11, %v177_v42  ;;  %s421_s7 = sshll.u32 %s149_s6, 4  ;;  %s889_s17 = scalar_lea.hbm %s933_s2, %s500_s5  ;;  %s891_s7 = int_to_ptr.vmem [resolvable:$true] %s421_s7 }
  0x37   : > { %580 = vpow2.f32 %v230_v35  ;;  %v369_v45 = vadd.f32 %v368_v41, %v367_v40  ;;  %v210_v50 = vmul.f32 0.5, %v192_v43  ;;  %v182_v52 = vsel %vm181_vm4, 16.62, %v179_v46  ;;  %s409_s13 = scalar_lea.sflag [#allocation3], %s148_s3  ;;  %s601_s21 = scalar_lea.vmem %s891_s7, 16 }
  0x38   : > { %v211_v53 = vmul.f32 0.5, %v193_v47  ;;  %v170_v55 = vsub.f32 %v160_v4, %v168_v44  ;;  %v171_v58 = vsub.f32 %v161_v5, %v169_v48  ;;  %v183_v60 = vsel %vm181_vm4, 10.52, %v180_v49  ;;  %p602_p9 = scmp.ne.s32.totalorder %s891_s7, %s601_s21 }
  0x39   : > { %370 = vadd.xlane.f32.xlu1 %v369_v45  ;;  %582 = vtanh.f32 %v210_v50  ;;  %v280_v5 = vstv %s807_s16  ;;  %v255_v10 = vstv %s831_s22  ;;  %v260_v16 = vstv %s838_s23  ;;  %s672_s22 = smov [#allocation5]  }
  0x3a   : > { %v567_v51 = vpop.eup %566  ;;  %584 = vtanh.f32 %v211_v53  ;;  %v265_v40 = vstv %s852_s25  ;;  %v270_v43 = vstv %s855_s26  ;;  %vm391_vm7 = vcmp.eq.s32.totalorder %v756_v1, 0  ;;  %p603_p10 = pnand %p602_p9, %p726_p5  ;;  %s605_s23 = sshll.u32 %s672_s22, 4  ;;  %s606_s23 = int_to_ptr.vmem [resolvable:$false] %s605_s23 }
  0x3b   : > { %v569_v54 = vpop.eup %568  ;;  %v198_v56 = vmul.f32 0.5, %v567_v51  ;;  %vm394_vm8 = vcmp.eq.s32.totalorder %v756_v1, 1  ;;  %vm397_vm9 = vcmp.eq.s32.totalorder %v756_v1, 2  ;;  %vm400_vm10 = vcmp.eq.s32.totalorder %v756_v1, 3  ;;  %s607_s24 = scalar_lea.vmem %s606_s23, 32  ;;  %p608_p13 = scmp.lt.s32.totalorder %s891_s7, %s606_s23 }
  0x3c   : > { %v571_v57 = vpop.eup %570  ;;  %v199_v59 = vmul.f32 0.5, %v569_v54  ;;  %vm403_vm11 = vcmp.eq.s32.totalorder %v756_v1, 4  ;;  %p604_p12 = pneg %p603_p10  ;;  %p609_p0 = scmp.lt.s32.totalorder %s607_s24, %s601_s21 }
  0x3d   : > { %v573_v61 = vpop.eup %572  ;;  %v200_v62 = vadd.f32 0.5, %v198_v56  ;;  %v840_v63 = vmul.f32 %v571_v57, %v182_v52 }
  0x3e   : > { %v575_v4 = vpop.eup %574  ;;  %v201_v6 = vadd.f32 0.5, %v199_v59  ;;  %v844_v3 = vmul.f32 %v573_v61, %v182_v52  ;;  %p610_p1 = por %p609_p0, %p608_p13 }
  0x3f   : > { %v577_v2 = vpop.eup %576  ;;  %v496_v7 = vadd.f32 -0.5, %v200_v62  ;;  %v218_v8 = vadd.f32 %v200_v62, %v170_v55  ;;  %v206_v9 = vmul.f32 0.5, %v575_v4  ;;  %v235_v21 = vmul.f32 0.5, %v840_v63 }
  0x40   : > { %v579_v11 = vpop.eup %578  ;;  %v497_v12 = vadd.f32 -0.5, %v201_v6  ;;  %v207_v13 = vmul.f32 0.5, %v577_v2  ;;  %v234_v14 = vmul.f32 0.5, %v844_v3  ;;  %v219_v22 = vadd.f32 %v201_v6, %v171_v58  ;;  %p611_p2 = pnand %p610_p1, %p604_p12 }
  0x41   : > { %v581_v17 = vpop.eup %580  ;;  %v306_v18 = vmul.f32 %v496_v7, %v496_v7  ;;  %v208_v19 = vadd.f32 0.5, %v206_v9  ;;  %v232_v20 = vmul.f32 %v579_v11, %v183_v60  ;;  %v274_v44 = vadd.f32 %v273_v0, %v844_v3 }
  0x42   : > { %v307_v23 = vmul.f32 %v497_v12, %v497_v12  ;;  %v209_v25 = vadd.f32 0.5, %v207_v13  ;;  %v233_v26 = vmul.f32 %v581_v17, %v183_v60  ;;  %v253_v30 = vsub.f32 %v218_v8, %v234_v14 }
  0x43   : > { %v331_v27 = vsel %vm330_vm1, %v306_v18, 0.0  ;;  %v220_v28 = vadd.f32 %v208_v19, %v166_v32  ;;  %v498_v29 = vadd.f32 -0.5, %v208_v19  ;;  %v236_v35 = vmul.f32 0.5, %v232_v20  ;;  %v583_v15 = vpop.eup %582 }
  0x44   : > { %v332_v31 = vsel %vm330_vm1, %v307_v23, 0.0  ;;  %v221_v33 = vadd.f32 %v209_v25, %v167_v37  ;;  %v499_v34 = vadd.f32 -0.5, %v209_v25  ;;  %v237_v39 = vmul.f32 0.5, %v233_v26  ;;  %v585_v46 = vpop.eup %584 }
  0x45   : > { %v333_v36 = vadd.f32 %v332_v31, %v331_v27  ;;  %v312_v38 = vmul.f32 %v498_v29, %v498_v29  ;;  %v254_v42 = vsub.f32 %v219_v22, %v235_v21  ;;  %v256_v45 = vmin.f32 %v253_v30, %v255_v10 }
  0x46   : > { %v313_v41 = vmul.f32 %v499_v34, %v499_v34  ;;  %v258_v24 = vadd.f32 %v234_v14, %v218_v8  ;;  %v259_v37 = vadd.f32 %v235_v21, %v219_v22  ;;  %v263_v49 = vsub.f32 %v220_v28, %v236_v35 }
  0x47   : > { %334 = vadd.xlane.f32.xlu0 %v333_v36  ;;  %v343_v32 = vsel %vm330_vm1, %v312_v38, 0.0  ;;  %v257_v48 = vmin.f32 %v254_v42, %v255_v10  ;;  %v264_v50 = vsub.f32 %v221_v33, %v237_v39  ;;  %v268_v54 = vadd.f32 %v236_v35, %v220_v28 }
  0x48   : > { %v344_v47 = vsel %vm330_vm1, %v313_v41, 0.0  ;;  %v261_v52 = vmax.f32 %v258_v24, %v260_v16  ;;  %v262_v53 = vmax.f32 %v259_v37, %v260_v16  ;;  %v266_v55 = vmin.f32 %v263_v49, %v265_v40 }
  0x49   : > { %v345_v51 = vadd.f32 %v344_v47, %v343_v32  ;;  %v267_v56 = vmin.f32 %v264_v50, %v265_v40  ;;  %v269_v57 = vadd.f32 %v237_v39, %v221_v33  ;;  %v275_v58 = vadd.f32 %v273_v0, %v840_v63 }
  0x4a   : > { %v271_v59 = vmax.f32 %v268_v54, %v270_v43  ;;  %v276_v60 = vsub.f32 %v261_v52, %v256_v45  ;;  %v277_v61 = vsub.f32 %v262_v53, %v257_v48  ;;  %v281_v62 = vadd.f32 %v280_v5, %v232_v20 }
  0x4b   : > { %346 = vadd.xlane.f32.xlu0 %v345_v51  ;;  %v272_v4 = vmax.f32 %v269_v57, %v270_v43  ;;  %v282_v6 = vadd.f32 %v280_v5, %v233_v26  ;;  %v293_v9 = vmul.f32 %v232_v20, %v844_v3  ;;  %v214_v10 = vmul.f32 0.5, %v583_v15 }
  0x4c   : > { %v278_v2 = vsub.f32 %v274_v44, %v276_v60  ;;  %v279_v7 = vsub.f32 %v275_v58, %v277_v61  ;;  %v283_v8 = vsub.f32 %v271_v59, %v266_v55  ;;  %v294_v12 = vmul.f32 %v233_v26, %v840_v63 }
  0x4d   : > { %v284_v11 = vsub.f32 %v272_v4, %v267_v56  ;;  %v295_v13 = vstv %s252_s27  ;;  %v215_v0 = vmul.f32 0.5, %v585_v46  ;;  %v216_v22 = vadd.f32 0.5, %v214_v10 }
  0x4e   : > { %v285_v14 = vsub.f32 %v281_v62, %v283_v8  ;;  %v287_v16 = vmax.f32 %v278_v2, 0.0  ;;  %v288_v18 = vmax.f32 %v279_v7, 0.0  ;;  %v296_v21 = vadd.f32 %v295_v13, %v293_v9 }
  0x4f   : > { %v286_v17 = vsub.f32 %v282_v6, %v284_v11  ;;  %v297_v5 = vadd.f32 %v295_v13, %v294_v12  ;;  %v217_v25 = vadd.f32 0.5, %v215_v0  ;;  %v324_v20 = vmul.f32 %v216_v22, %v216_v22 }
  0x50   : > { %v289_v19 = vmax.f32 %v285_v14, 0.0 }
  0x51   : > { %v290_v23 = vmax.f32 %v286_v17, 0.0  ;;  %v325_v31 = vmul.f32 %v217_v25, %v217_v25 }
  0x52   : > { %v291_v27 = vmul.f32 %v289_v19, %v287_v16 }
  0x53   : > { %v292_v28 = vmul.f32 %v290_v23, %v288_v18 }
  0x54   : > { %v298_v29 = vsub.f32 %v296_v21, %v291_v27 }
  0x55   : > { %v299_v3 = vsub.f32 %v297_v5, %v292_v28 }
  0x56   : > { %v300_v30 = vmul.f32 0.6, %v298_v29 }
  0x57   : > { %v301_v63 = vmul.f32 0.6, %v299_v3 }
  0x58   : > { %vm302_vm5 = vcmp.gt.f32.partialorder %v291_v27, %v300_v30 }
  0x59   : > { %vm303_vm6 = vcmp.gt.f32.partialorder %v292_v28, %v301_v63  ;;  %v326_v26 = vsel %vm302_vm5, 0.0, %v324_v20 }
  0x5a   : > { %v327_v33 = vsel %vm303_vm6, 0.0, %v325_v31  ;;  %v379_v34 = vsel %vm330_vm1, %v326_v26, 0.0 }
  0x5b   : > { %v380_v35 = vsel %vm330_vm1, %v327_v33, 0.0 }
  0x5c   : > { %v381_v36 = vadd.f32 %v380_v35, %v379_v34 }
  0x5e   : > { %382 = vadd.xlane.f32.xlu0 %v381_v36 }
  0xc2   : > { %v359_v38 = vpop.xlane.xlu1 %358 }
  0xc3   : > { %v360_v40 = vrot.slane %v359_v38, 4 }
  0xc5   : > { %v361_v42 = vadd.f32 %v360_v40, %v359_v38 }
  0xc6   : > { %v371_v39 = vpop.xlane.xlu1 %370 }
  0xc7   : > { %v372_v41 = vrot.slane %v371_v39, 4  ;;  %v362_v32 = vrot.slane %v361_v42, 2 }
  0xc9   : > { %v373_v43 = vadd.f32 %v372_v41, %v371_v39  ;;  %v363_v48 = vadd.f32 %v362_v32, %v361_v42 }
  0xcb   : > { %v374_v24 = vrot.slane %v373_v43, 2  ;;  %v364_v54 = vrot.slane %v363_v48, 1 }
  0xcd   : > { %v375_v50 = vadd.f32 %v374_v24, %v373_v43  ;;  %v365_v59 = vadd.f32 %v364_v54, %v363_v48 }
  0xcf   : > { %v376_v57 = vrot.slane %v375_v50, 1 }
  0xd1   : > { %v377_v61 = vadd.f32 %v376_v57, %v375_v50 }
  0xd4   : > { %v335_v44 = vpop.xlane.xlu0 %334 }
  0xd5   : > { %v336_v15 = vrot.slane %v335_v44, 4 }
  0xd7   : > { %v337_v45 = vadd.f32 %v336_v15, %v335_v44 }
  0xd8   : > { %v347_v37 = vpop.xlane.xlu0 %346 }
  0xd9   : > { %v338_v46 = vrot.slane %v337_v45, 2  ;;  %v348_v47 = vrot.slane %v347_v37, 4 }
  0xdb   : > { %v349_v49 = vadd.f32 %v348_v47, %v347_v37  ;;  %v339_v51 = vadd.f32 %v338_v46, %v337_v45 }
  0xdd   : > { %v350_v52 = vrot.slane %v349_v49, 2  ;;  %v340_v53 = vrot.slane %v339_v51, 1 }
  0xdf   : > { %v341_v55 = vadd.f32 %v340_v53, %v339_v51  ;;  %v351_v56 = vadd.f32 %v350_v52, %v349_v49 }
  0xe1   : > { %504 = vpush %v341_v55  ;;  %v352_v58 = vrot.slane %v351_v56, 1 }
  0xe3   : > { %v353_v60 = vadd.f32 %v352_v58, %v351_v56 }
  0xe5   : > { %506 = vpush %v353_v60 }
  0xe6   : > { %508 = vpush %v365_v59 }
  0xe7   : > { %510 = vpush %v377_v61 }
  0xeb   : > { %v383_v62 = vpop.xlane.xlu0 %382 }
  0xec   : > { %v384_v4 = vrot.slane %v383_v62, 4 }
  0xee   : > { %v385_v6 = vadd.f32 %v384_v4, %v383_v62 }
  0xf0   : > { %v386_v2 = vrot.slane %v385_v6, 2 }
  0xf2   : > { %v387_v7 = vadd.f32 %v386_v2, %v385_v6 }
  0xf4   : > { %v388_v8 = vrot.slane %v387_v7, 1 }
  0xf6   : > { %v389_v9 = vadd.f32 %v388_v8, %v387_v7 }
  0xf8   : > { %512 = vpush %v389_v9 }
 0x112   : > { %s505_s28 = spop %504 }
 0x113   : > { %v392_v10 = vstv %s505_s28 }
 0x114   : > { %v393_v11 = vsel %vm391_vm7, %v392_v10, 0.0 }
 0x116   : > { %s507_s29 = spop %506 }
 0x117   : > { %v395_v12 = vstv %s507_s29  ;;  %s509_s30 = spop %508 }
 0x118   : > { %v396_v13 = vsel %vm394_vm8, %v395_v12, %v393_v11  ;;  %v398_v0 = vstv %s509_s30  ;;  %s511_s4 = spop %510 }
 0x119   : > { %v399_v14 = vsel %vm397_vm9, %v398_v0, %v396_v13  ;;  %v401_v16 = vstv %s511_s4 }
 0x11a   : > { %v402_v17 = vsel %vm400_vm10, %v401_v16, %v399_v14 }
 0x129   : > { %s513_s8 = spop %512 }
 0x12a   : > { %v404_v18 = vstv %s513_s8 }
 0x12b   : > { %v405_v19 = vsel %vm403_vm11, %v404_v18, %v402_v17 }
 0x12c   : > { %407 = vst.msk [vmem:[%s149_s6] sm:$0x1] %vm406_vm12, %v405_v19 }
 0x12d   : > { %614 = shalt.err (!%p611_p2)
}
 0x12e   : > { %s615_s25 = scalar_lea.hbm %s889_s17, 16  ;;  %s619_s28 = scalar_lea.hbm %s933_s2, 32 }
 0x12f   : > { %p616_p3 = scmp.ne.s32.totalorder %s889_s17, %s615_s25  ;;  %p620_p8 = scmp.lt.u32.totalorder %s889_s17, %s933_s2 }
 0x130   : > { %p621_p11 = scmp.lt.u32.totalorder %s619_s28, %s615_s25  ;;  %p623_p10 = scmp.lt.u32.totalorder %s615_s25, %s889_s17 }
 0x131   : > { %p617_p4 = pnand %p616_p3, %p726_p5 }
 0x132   : > { %p622_p9 = por %p621_p11, %p620_p8 }
 0x133   : > { %p618_p7 = pneg %p617_p4 }
 0x134   : > { %p624_p12 = por %p623_p10, %p622_p9 }
 0x136   : > { %p625_p13 = pnand %p624_p12, %p618_p7 }
 0x138   : > { %628 = shalt.err (!%p625_p13)
}
 0x139   : > { %518 = dma.vmem_to_hbm [thread:$0]  (%p726_p5), %s891_s7, 16, %s889_s17, %s409_s13  }
 0x13a PF: > { %p530_p0 = scmp.ge.s32.totalorder %s667_s12, 2  ;;  %s433_s3 = sand.u32 1, %s655_s9  }
 0x13b   : > { %s434_s4 = scalar_lea.sflag [#allocation3], %s433_s3 }
 0x13c   : > { %p525_p1 = pnand %p530_p0, %p730_p6 }
 0x13e   : > { %650 = dma.done.wait (!%p525_p1), %s434_s4, 16  }
 0x13f   : > { %652 = vsyncadd (!%p525_p1), %s434_s4, 4294967280  ;;  %p13_p2 = scmp.ge.s32.totalorder %s713_s15, 4   ;;  %s937_s9 = smov %s659_s10 }
 0x140   : > { %s938_s10 = smov %s663_s11  ;;  %s939_s11 = smov %s724_s18 }
 0x141   : > { %s940_s12 = smov %s713_s15  ;;  %15 = sbr.rel (!%p13_p2) target bundleno = 4 (0x4), region = 68 }
 0x148   :  { %438 = vsyncpa [#allocation3], 1 }
 0x149   :  { %440 = vsyncpa [#allocation3 + $0x1], 1 }
 0x14a   :  { %441 = vsyncpa [#allocation4], 1 }
 0x14b   :  { %443 = vsyncpa [#allocation4 + $0x1], 1 }

</bundles_post_ra>
